<compile_context>
chip_gen: v7x
topology: tpu7x:2x2x1
jax: 0.10.0
libtpu: 0.0.40
codegen_flags: <defaults>
</compile_context>

<pallas_src>
import jax
import jax.numpy as jnp
import numpy as np
from jax.experimental import pallas as pl
from jax.experimental.pallas import tpu as pltpu


def _round_up(n, m):
    return ((n + m - 1) // m) * m


def critic_kernel(x_ref,
                  w1_ref, b1_ref,
                  w2_ref, b2_ref,
                  w3_ref, b3_ref,
                  w4_ref, b4_ref,
                  wq_ref, bq_ref,
                  out_ref):
    f32 = jnp.float32
    bf16 = jnp.bfloat16

    # MXU matmuls: bf16 operands, f32 accumulation. Bias/ReLU in f32 (VPU).
    x = x_ref[...].astype(bf16)
    h = jnp.dot(x, w1_ref[...], preferred_element_type=f32) + b1_ref[...]
    h = jnp.maximum(h, 0.0)

    h = jnp.dot(h.astype(bf16), w2_ref[...], preferred_element_type=f32) + b2_ref[...]
    h = jnp.maximum(h, 0.0)

    # Dropout(p=0.1) is identity at inference time (module in eval mode).
    # TODO(synk): training-mode dropout (pltpu.prng_seed + pltpu.stateful_bernoulli) not wired in.

    h = jnp.dot(h.astype(bf16), w3_ref[...], preferred_element_type=f32) + b3_ref[...]
    h = jnp.maximum(h, 0.0)

    h = jnp.dot(h.astype(bf16), w4_ref[...], preferred_element_type=f32) + b4_ref[...]
    h = jnp.maximum(h, 0.0)

    # Final H -> 1 layer off the MXU: VPU multiply + lane reduce (f32).
    q = jnp.sum(h * wq_ref[...], axis=-1, keepdims=True) + bq_ref[...]
    out_ref[...] = q.astype(out_ref.dtype)


def critic_forward(x, params, *, tile_b=None):
    """x: [B, input_dim] float32; params: dict of pre-transposed f32 weights/biases."""
    B, d_in = x.shape
    H = params["w1"].shape[1]

    # --- lane-dense feature padding (zeros contribute nothing to the matmul) ---
    d_pad = _round_up(d_in, 128)
    w1 = params["w1"]
    if d_pad != d_in:
        x = jnp.pad(x, ((0, 0), (0, d_pad - d_in)))
        w1 = jnp.pad(w1, ((0, d_pad - d_in), (0, 0)))

    # --- batch tiling: big tiles for MXU utilization, >=2 grid steps when B allows ---
    if tile_b is None:
        tile_b = max(8, min(512, _round_up(-(-B // 2), 8)))
    tile_b = _round_up(tile_b, 8)

    Bp = _round_up(B, tile_b)
    if Bp != B:
        x = jnp.pad(x, ((0, Bp - B), (0, 0)))

    # --- MXU operands in bf16 (weights cast once here) ---
    bf16 = jnp.bfloat16
    w1b = w1.astype(bf16)
    w2b = params["w2"].astype(bf16)
    w3b = params["w3"].astype(bf16)
    w4b = params["w4"].astype(bf16)
    b1, b2, b3, b4 = params["b1"], params["b2"], params["b3"], params["b4"]
    wq_row = params["wq"].reshape(1, H).astype(jnp.float32)  # VPU path stays f32
    bq = params["bq"].reshape(1, 1).astype(jnp.float32)

    def full_spec(shape):
        nd = len(shape)
        return pl.BlockSpec(shape, lambda i: (0,) * nd)

    consts = (w1b, b1, w2b, b2, w3b, b3, w4b, b4, wq_row, bq)
    flops = 2 * Bp * (d_pad * H + 3 * H * H + H)
    bytes_accessed = (x.size * x.dtype.itemsize
                      + sum(int(a.size) * a.dtype.itemsize for a in consts)
                      + Bp * 4)
    cost = pl.CostEstimate(flops=flops, transcendentals=0,
                           bytes_accessed=bytes_accessed)

    grid_spec = pltpu.PrefetchScalarGridSpec(
        num_scalar_prefetch=0,
        grid=(Bp // tile_b,),
        in_specs=[
            pl.BlockSpec((tile_b, d_pad), lambda i: (i, 0)),  # x tile
            full_spec(w1b.shape), full_spec(b1.shape),
            full_spec(w2b.shape), full_spec(b2.shape),
            full_spec(w3b.shape), full_spec(b3.shape),
            full_spec(w4b.shape), full_spec(b4.shape),
            full_spec(wq_row.shape), full_spec(bq.shape),
        ],
        out_specs=pl.BlockSpec((tile_b, 1), lambda i: (i, 0)),
    )

    out = pl.pallas_call(
        critic_kernel,
        out_shape=jax.ShapeDtypeStruct((Bp, 1), jnp.float32),
        grid_spec=grid_spec,
        compiler_params=pltpu.CompilerParams(
            dimension_semantics=("parallel",),
            vmem_limit_bytes=48 * 1024 * 1024),
        cost_estimate=cost,
    )(x, w1b, b1, w2b, b2, w3b, b3, w4b, b4, wq_row, bq)

    return out[:B]


def _init_linear(kw, kb, fan_in, fan_out):
    # Mirror PyTorch nn.Linear default init: U(-1/sqrt(fan_in), 1/sqrt(fan_in)),
    # stored pre-transposed as [fan_in, fan_out].
    bound = 1.0 / float(np.sqrt(fan_in))
    w = jax.random.uniform(kw, (fan_in, fan_out), jnp.float32, -bound, bound)
    b = jax.random.uniform(kb, (1, fan_out), jnp.float32, -bound, bound)
    return w, b


def _reference_forward_bf16(x, params):
    """Reference mirroring the kernel's numerics (bf16 MXU operands, f32 accum)."""
    bf16, f32 = jnp.bfloat16, jnp.float32
    d_in = x.shape[1]
    d_pad = _round_up(d_in, 128)
    w1 = params["w1"]
    if d_pad != d_in:
        x = jnp.pad(x, ((0, 0), (0, d_pad - d_in)))
        w1 = jnp.pad(w1, ((0, d_pad - d_in), (0, 0)))

    h = jnp.maximum(jnp.dot(x.astype(bf16), w1.astype(bf16),
                            preferred_element_type=f32) + params["b1"], 0.0)
    h = jnp.maximum(jnp.dot(h.astype(bf16), params["w2"].astype(bf16),
                            preferred_element_type=f32) + params["b2"], 0.0)
    # dropout identity (eval)
    h = jnp.maximum(jnp.dot(h.astype(bf16), params["w3"].astype(bf16),
                            preferred_element_type=f32) + params["b3"], 0.0)
    h = jnp.maximum(jnp.dot(h.astype(bf16), params["w4"].astype(bf16),
                            preferred_element_type=f32) + params["b4"], 0.0)
    H = params["w1"].shape[1]
    wq_row = params["wq"].reshape(1, H).astype(f32)
    return jnp.sum(h * wq_row, axis=-1, keepdims=True) + params["bq"].reshape(1, 1)


if __name__ == "__main__":
    B = 24          # small, ragged batch (exercises padding + a 2-step grid)
    INPUT_DIM = 70  # critic input dim (state + action features); padded to 128
    H = 128         # `density` (small, lane-aligned stand-in for 512)

    key = jax.random.PRNGKey(0)
    ks = jax.random.split(key, 11)

    w1, b1 = _init_linear(ks[0], ks[1], INPUT_DIM, H)
    w2, b2 = _init_linear(ks[2], ks[3], H, H)
    w3, b3 = _init_linear(ks[4], ks[5], H, H)
    w4, b4 = _init_linear(ks[6], ks[7], H, H)
    wq, bq = _init_linear(ks[8], ks[9], H, 1)
    params = dict(w1=w1, b1=b1, w2=w2, b2=b2, w3=w3, b3=b3,
                  w4=w4, b4=b4, wq=wq, bq=bq)

    x = jax.random.normal(ks[10], (B, INPUT_DIM), jnp.float32)

    out = critic_forward(x, params)
    out = jax.block_until_ready(out)

    ref = _reference_forward_bf16(x, params)
    np.testing.assert_allclose(np.asarray(out), np.asarray(ref),
                               rtol=2e-3, atol=2e-3)
    assert out.shape == (B, 1)

    print("KERNEL_OK")
</pallas_src>

<mosaic_0001>
module attributes {stable_mosaic.version = 11 : i64} {
  func.func @critic_kernel(%arg0: i32, %arg1: memref<16x128xf32, #tpu.memory_space<vmem>>, %arg2: memref<128x128xbf16, #tpu.memory_space<vmem>>, %arg3: memref<1x128xf32, #tpu.memory_space<vmem>>, %arg4: memref<128x128xbf16, #tpu.memory_space<vmem>>, %arg5: memref<1x128xf32, #tpu.memory_space<vmem>>, %arg6: memref<128x128xbf16, #tpu.memory_space<vmem>>, %arg7: memref<1x128xf32, #tpu.memory_space<vmem>>, %arg8: memref<128x128xbf16, #tpu.memory_space<vmem>>, %arg9: memref<1x128xf32, #tpu.memory_space<vmem>>, %arg10: memref<1x128xf32, #tpu.memory_space<vmem>>, %arg11: memref<1x1xf32, #tpu.memory_space<vmem>>, %arg12: memref<16x1xf32, #tpu.memory_space<vmem>>) attributes {dimension_semantics = [#tpu.dimension_semantics<parallel>], iteration_bounds = array<i64: 2>, scalar_prefetch = 0 : i64, scratch_operands = 0 : i64, tpu.core_type = #tpu.core_type<tc>, window_params = [{transform_indices = @transform_0, window_bounds = array<i64: 16, 128>}, {pipeline_mode = #tpu.pipeline_mode<synchronous>, transform_indices = @transform_1, window_bounds = array<i64: 128, 128>}, {pipeline_mode = #tpu.pipeline_mode<synchronous>, transform_indices = @transform_2, window_bounds = array<i64: 1, 128>}, {pipeline_mode = #tpu.pipeline_mode<synchronous>, transform_indices = @transform_3, window_bounds = array<i64: 128, 128>}, {pipeline_mode = #tpu.pipeline_mode<synchronous>, transform_indices = @transform_4, window_bounds = array<i64: 1, 128>}, {pipeline_mode = #tpu.pipeline_mode<synchronous>, transform_indices = @transform_5, window_bounds = array<i64: 128, 128>}, {pipeline_mode = #tpu.pipeline_mode<synchronous>, transform_indices = @transform_6, window_bounds = array<i64: 1, 128>}, {pipeline_mode = #tpu.pipeline_mode<synchronous>, transform_indices = @transform_7, window_bounds = array<i64: 128, 128>}, {pipeline_mode = #tpu.pipeline_mode<synchronous>, transform_indices = @transform_8, window_bounds = array<i64: 1, 128>}, {pipeline_mode = #tpu.pipeline_mode<synchronous>, transform_indices = @transform_9, window_bounds = array<i64: 1, 128>}, {pipeline_mode = #tpu.pipeline_mode<synchronous>, transform_indices = @transform_10, window_bounds = array<i64: 1, 1>}, {transform_indices = @transform_11, window_bounds = array<i64: 16, 1>}]} {
    %c0 = arith.constant 0 : index
    %c0_0 = arith.constant 0 : index
    %0 = vector.load %arg1[%c0, %c0_0] : memref<16x128xf32, #tpu.memory_space<vmem>>, vector<16x128xf32>
    %1 = arith.truncf %0 : vector<16x128xf32> to vector<16x128xbf16>
    %c0_1 = arith.constant 0 : index
    %c0_2 = arith.constant 0 : index
    %2 = vector.load %arg2[%c0_1, %c0_2] : memref<128x128xbf16, #tpu.memory_space<vmem>>, vector<128x128xbf16>
    %cst = arith.constant dense<0.000000e+00> : vector<16x128xf32>
    %3 = tpu.matmul %1, %2, %cst {dimension_numbers = #tpu.dot_dimension_numbers<[1], [0], [0], [1], [0, 0, 1, 1], [], []>} : vector<16x128xbf16>, vector<128x128xbf16>, vector<16x128xf32> -> vector<16x128xf32>
    %c0_3 = arith.constant 0 : index
    %c0_4 = arith.constant 0 : index
    %4 = vector.load %arg3[%c0_3, %c0_4] : memref<1x128xf32, #tpu.memory_space<vmem>>, vector<1x128xf32>
    %5 = vector.broadcast %4 : vector<1x128xf32> to vector<16x128xf32>
    %6 = arith.addf %3, %5 : vector<16x128xf32>
    %cst_5 = arith.constant 0.000000e+00 : f32
    %7 = vector.broadcast %cst_5 : f32 to vector<16x128xf32>
    %8 = arith.maximumf %6, %7 : vector<16x128xf32>
    %9 = arith.truncf %8 : vector<16x128xf32> to vector<16x128xbf16>
    %c0_6 = arith.constant 0 : index
    %c0_7 = arith.constant 0 : index
    %10 = vector.load %arg4[%c0_6, %c0_7] : memref<128x128xbf16, #tpu.memory_space<vmem>>, vector<128x128xbf16>
    %cst_8 = arith.constant dense<0.000000e+00> : vector<16x128xf32>
    %11 = tpu.matmul %9, %10, %cst_8 {dimension_numbers = #tpu.dot_dimension_numbers<[1], [0], [0], [1], [0, 0, 1, 1], [], []>} : vector<16x128xbf16>, vector<128x128xbf16>, vector<16x128xf32> -> vector<16x128xf32>
    %c0_9 = arith.constant 0 : index
    %c0_10 = arith.constant 0 : index
    %12 = vector.load %arg5[%c0_9, %c0_10] : memref<1x128xf32, #tpu.memory_space<vmem>>, vector<1x128xf32>
    %13 = vector.broadcast %12 : vector<1x128xf32> to vector<16x128xf32>
    %14 = arith.addf %11, %13 : vector<16x128xf32>
    %cst_11 = arith.constant 0.000000e+00 : f32
    %15 = vector.broadcast %cst_11 : f32 to vector<16x128xf32>
    %16 = arith.maximumf %14, %15 : vector<16x128xf32>
    %17 = arith.truncf %16 : vector<16x128xf32> to vector<16x128xbf16>
    %c0_12 = arith.constant 0 : index
    %c0_13 = arith.constant 0 : index
    %18 = vector.load %arg6[%c0_12, %c0_13] : memref<128x128xbf16, #tpu.memory_space<vmem>>, vector<128x128xbf16>
    %cst_14 = arith.constant dense<0.000000e+00> : vector<16x128xf32>
    %19 = tpu.matmul %17, %18, %cst_14 {dimension_numbers = #tpu.dot_dimension_numbers<[1], [0], [0], [1], [0, 0, 1, 1], [], []>} : vector<16x128xbf16>, vector<128x128xbf16>, vector<16x128xf32> -> vector<16x128xf32>
    %c0_15 = arith.constant 0 : index
    %c0_16 = arith.constant 0 : index
    %20 = vector.load %arg7[%c0_15, %c0_16] : memref<1x128xf32, #tpu.memory_space<vmem>>, vector<1x128xf32>
    %21 = vector.broadcast %20 : vector<1x128xf32> to vector<16x128xf32>
    %22 = arith.addf %19, %21 : vector<16x128xf32>
    %cst_17 = arith.constant 0.000000e+00 : f32
    %23 = vector.broadcast %cst_17 : f32 to vector<16x128xf32>
    %24 = arith.maximumf %22, %23 : vector<16x128xf32>
    %25 = arith.truncf %24 : vector<16x128xf32> to vector<16x128xbf16>
    %c0_18 = arith.constant 0 : index
    %c0_19 = arith.constant 0 : index
    %26 = vector.load %arg8[%c0_18, %c0_19] : memref<128x128xbf16, #tpu.memory_space<vmem>>, vector<128x128xbf16>
    %cst_20 = arith.constant dense<0.000000e+00> : vector<16x128xf32>
    %27 = tpu.matmul %25, %26, %cst_20 {dimension_numbers = #tpu.dot_dimension_numbers<[1], [0], [0], [1], [0, 0, 1, 1], [], []>} : vector<16x128xbf16>, vector<128x128xbf16>, vector<16x128xf32> -> vector<16x128xf32>
    %c0_21 = arith.constant 0 : index
    %c0_22 = arith.constant 0 : index
    %28 = vector.load %arg9[%c0_21, %c0_22] : memref<1x128xf32, #tpu.memory_space<vmem>>, vector<1x128xf32>
    %29 = vector.broadcast %28 : vector<1x128xf32> to vector<16x128xf32>
    %30 = arith.addf %27, %29 : vector<16x128xf32>
    %cst_23 = arith.constant 0.000000e+00 : f32
    %31 = vector.broadcast %cst_23 : f32 to vector<16x128xf32>
    %32 = arith.maximumf %30, %31 : vector<16x128xf32>
    %c0_24 = arith.constant 0 : index
    %c0_25 = arith.constant 0 : index
    %33 = vector.load %arg10[%c0_24, %c0_25] : memref<1x128xf32, #tpu.memory_space<vmem>>, vector<1x128xf32>
    %34 = vector.broadcast %33 : vector<1x128xf32> to vector<16x128xf32>
    %35 = arith.mulf %32, %34 : vector<16x128xf32>
    %cst_26 = arith.constant dense<0.000000e+00> : vector<16xf32>
    %36 = vector.multi_reduction <add>, %35, %cst_26 [1] : vector<16x128xf32> to vector<16xf32>
    %37 = vector.shape_cast %36 : vector<16xf32> to vector<16x1xf32>
    %c0_27 = arith.constant 0 : index
    %c0_28 = arith.constant 0 : index
    %38 = vector.load %arg11[%c0_27, %c0_28] : memref<1x1xf32, #tpu.memory_space<vmem>>, vector<1x1xf32>
    %39 = vector.broadcast %38 : vector<1x1xf32> to vector<16x1xf32>
    %40 = arith.addf %37, %39 : vector<16x1xf32>
    %c0_29 = arith.constant 0 : index
    %c0_30 = arith.constant 0 : index
    %41 = vector.load %arg12[%c0_29, %c0_30] : memref<16x1xf32, #tpu.memory_space<vmem>>, vector<16x1xf32>
    tpu.vector_store %arg12[%c0_29, %c0_30], %40 {strides = array<i32>} : memref<16x1xf32, #tpu.memory_space<vmem>>, vector<16x1xf32>,
    return
  }
  func.func @transform_0(%arg0: i32) -> (i32, i32) {
    %c0_i32 = arith.constant 0 : i32
    %c0_i32_0 = arith.constant 0 : i32
    return %arg0, %c0_i32 : i32, i32
  }
  func.func @transform_1(%arg0: i32) -> (i32, i32) {
    %c0_i32 = arith.constant 0 : i32
    %c0_i32_0 = arith.constant 0 : i32
    %c0_i32_1 = arith.constant 0 : i32
    return %c0_i32, %c0_i32_0 : i32, i32
  }
  func.func @transform_2(%arg0: i32) -> (i32, i32) {
    %c0_i32 = arith.constant 0 : i32
    %c0_i32_0 = arith.constant 0 : i32
    %c0_i32_1 = arith.constant 0 : i32
    return %c0_i32, %c0_i32_0 : i32, i32
  }
  func.func @transform_3(%arg0: i32) -> (i32, i32) {
    %c0_i32 = arith.constant 0 : i32
    %c0_i32_0 = arith.constant 0 : i32
    %c0_i32_1 = arith.constant 0 : i32
    return %c0_i32, %c0_i32_0 : i32, i32
  }
  func.func @transform_4(%arg0: i32) -> (i32, i32) {
    %c0_i32 = arith.constant 0 : i32
    %c0_i32_0 = arith.constant 0 : i32
    %c0_i32_1 = arith.constant 0 : i32
    return %c0_i32, %c0_i32_0 : i32, i32
  }
  func.func @transform_5(%arg0: i32) -> (i32, i32) {
    %c0_i32 = arith.constant 0 : i32
    %c0_i32_0 = arith.constant 0 : i32
    %c0_i32_1 = arith.constant 0 : i32
    return %c0_i32, %c0_i32_0 : i32, i32
  }
  func.func @transform_6(%arg0: i32) -> (i32, i32) {
    %c0_i32 = arith.constant 0 : i32
    %c0_i32_0 = arith.constant 0 : i32
    %c0_i32_1 = arith.constant 0 : i32
    return %c0_i32, %c0_i32_0 : i32, i32
  }
  func.func @transform_7(%arg0: i32) -> (i32, i32) {
    %c0_i32 = arith.constant 0 : i32
    %c0_i32_0 = arith.constant 0 : i32
    %c0_i32_1 = arith.constant 0 : i32
    return %c0_i32, %c0_i32_0 : i32, i32
  }
  func.func @transform_8(%arg0: i32) -> (i32, i32) {
    %c0_i32 = arith.constant 0 : i32
    %c0_i32_0 = arith.constant 0 : i32
    %c0_i32_1 = arith.constant 0 : i32
    return %c0_i32, %c0_i32_0 : i32, i32
  }
  func.func @transform_9(%arg0: i32) -> (i32, i32) {
    %c0_i32 = arith.constant 0 : i32
    %c0_i32_0 = arith.constant 0 : i32
    %c0_i32_1 = arith.constant 0 : i32
    return %c0_i32, %c0_i32_0 : i32, i32
  }
  func.func @transform_10(%arg0: i32) -> (i32, i32) {
    %c0_i32 = arith.constant 0 : i32
    %c0_i32_0 = arith.constant 0 : i32
    %c0_i32_1 = arith.constant 0 : i32
    return %c0_i32, %c0_i32_0 : i32, i32
  }
  func.func @transform_11(%arg0: i32) -> (i32, i32) {
    %c0_i32 = arith.constant 0 : i32
    %c0_i32_0 = arith.constant 0 : i32
    return %arg0, %c0_i32 : i32, i32
  }
}

</mosaic_0001>

<bundles_post_ra>
// kernel: tpu_custom_call.1
= control target key start
LH: loop header
LB: loop body
LE: loop exit
PB: predicated region body
PF: predicated region fallthrough
CT: control target
= control target key end

     0   :  { %s1918_s0 = inlined_call_operand.hbm [shape: f32[32,128], index: 0, kind: input, shape index: {}]   ;;  %s1919_s1 = inlined_call_operand.hbm [shape: bf16[128,128], index: 1, kind: input, shape index: {}]   ;;  %s1920_s2 = inlined_call_operand.vmem [shape: f32[1,128], index: 2, kind: input, shape index: {}]   ;;  %s1921_s3 = inlined_call_operand.hbm [shape: bf16[128,128], index: 3, kind: input, shape index: {}]   ;;  %s1922_s4 = inlined_call_operand.vmem [shape: f32[1,128], index: 4, kind: input, shape index: {}]   ;;  %s1923_s5 = inlined_call_operand.hbm [shape: bf16[128,128], index: 5, kind: input, shape index: {}]   ;;  %s1924_s6 = inlined_call_operand.vmem [shape: f32[1,128], index: 6, kind: input, shape index: {}]   ;;  %s1925_s7 = inlined_call_operand.hbm [shape: bf16[128,128], index: 7, kind: input, shape index: {}]   ;;  %s1926_s8 = inlined_call_operand.vmem [shape: f32[1,128], index: 8, kind: input, shape index: {}]   ;;  %s1927_s9 = inlined_call_operand.vmem [shape: f32[1,128], index: 9, kind: input, shape index: {}]   ;;  %s1928_s10 = inlined_call_operand.<no memory space> [shape: f32[1,1], index: 10, kind: input, shape index: {}]   ;;  %s1929_s11 = inlined_call_operand.vmem [shape: f32[32,1], index: 11, kind: output, shape index: {}]  }
   0x1   :  { %1935 = sst [smem:[#allocation14_spill]] %s1927_s9  ;;  %v16_v0 = vstv %s1928_s10 }
   0x2   :  { %1936 = sst [smem:[#allocation15_spill]] %s1929_s11  ;;  %17 = vst [vmem:[#allocation2] sm:$0x1] %v16_v0 }
   0x3   :  { %18 = vsyncpa [#allocation4], 0 }
   0x4   :  { %20 = vsyncpa [#allocation4 + $0x1], 0 }
   0x5   :  { %21 = vsyncpa [#allocation6], 0 }
   0x6   :  { %22 = vsyncpa [#allocation9], 0  ;;  %s1616_s19 = smov 0   ;;  %s1618_s20 = smov 0  }
   0x7   :  { %s1620_s21 = smov 0   ;;  %s1622_s22 = smov 0  }
   0x8 LB: > { %s1932_s10 = sadd.s32 4294967295, %s1540_s22   ;;  %p48_p0 = scmp.ne.s32.totalorder %s1532_s20, %s1528_s19  ;;  %s1540_s22 = sphi %s1622_s22, %s1949_s22   ;;  %s1536_s21 = sphi %s1620_s21, %s1952_s21   ;;  %s1532_s20 = sphi %s1618_s20, %s1951_s20   ;;  %s1528_s19 = sphi %s1616_s19, %s1950_s19  }
   0x9   : > { %p1638_p1 = scmp.eq.s32.totalorder %s1932_s10, 0  ;;  %p1064_p2 = scmp.ge.s32.totalorder %s1540_s22, 1 }
   0xa   : > { %p295_p3 = scmp.lt.s32.totalorder %s1540_s22, 3  ;;  %s1542_s26 = smov [#allocation5]  }
   0xb   : > { %s1937_s23 = scalar_select %p1638_p1, 1, 0 }
   0xc   : > { %p1646_p4 = por %p1638_p1, %p48_p0  ;;  %p1650_p5 = pnand %p1064_p2, %p295_p3 }
   0xd   : > { %s307_s27 = sshll.u32 %s1542_s26, 4  ;;  %s1543_s29 = smov [#allocation8]   ;;  %s1654_s27 = int_to_ptr.vmem [resolvable:$true] %s307_s27 }
   0xe   : > { %s1938_s24 = scalar_select %p1646_p4, 1, 0 }
   0xf   : > { %s1939_s25 = scalar_select %p1650_p5, 1, 0 }
  0x10   : > { %p1256_p6 = pneg %p1650_p5  ;;  %s339_s30 = sshll.u32 %s1543_s29, 4  ;;  %s1664_s30 = int_to_ptr.vmem [resolvable:$true] %s339_s30 }
  0x11   : > { %s1544_s12 = smov [#allocation7]   ;;  %s1356_s16 = scalar_lea.hbm %s1919_s1, 1024 }
  0x12   : > { %p1660_p7 = pnand %p1256_p6, %p1638_p1  ;;  %s1666_s13 = sshll.u32 %s1544_s12, 4  ;;  %s324_s13 = int_to_ptr.vmem [resolvable:$true] %s1666_s13 }
  0x13   : > { %p1357_p8 = scmp.ne.s32.totalorder %s1919_s1, %s1356_s16  ;;  %p1363_p12 = scmp.lt.u32.totalorder %s1356_s16, %s1919_s1 }
  0x14   : > { %p1676_p9 = pneg %p1660_p7 }
  0x16   : > { %p1359_p10 = pnand %p1676_p9, %p1357_p8 }
  0x18   : > { %p1360_p11 = pneg %p1359_p10 }
  0x1a   : > { %p1365_p13 = pnand %p1363_p12, %p1360_p11 }
  0x1c   : > { %1368 = shalt.err (!%p1365_p13)
}
  0x1d   : > { %s1369_s12 = scalar_lea.vmem %s1654_s27, 1024  ;;  %p1377_p6 = scmp.lt.s32.totalorder %s1654_s27, %s1654_s27 }
  0x1e   : > { %p1370_p0 = scmp.ne.s32.totalorder %s1654_s27, %s1369_s12  ;;  %p1378_p1 = scmp.lt.s32.totalorder %s1369_s12, %s1369_s12 }
  0x20   : > { %p1372_p2 = pnand %p1370_p0, %p1676_p9  ;;  %p1379_p8 = por %p1378_p1, %p1377_p6 }
  0x22   : > { %p1373_p3 = pneg %p1372_p2 }
  0x24   : > { %p1380_p10 = pnand %p1379_p8, %p1373_p3 }
  0x26   : > { %1383 = shalt.err (!%p1380_p10)
}
  0x27   : > { %s1545_s14 = smov 64   ;;  %s1546_s15 = smov 4  }
  0x28   : > { %1259 = dma.hbm_to_vmem [thread:$0]  (!%p1660_p7), %s1919_s1, 1024, %s1654_s27, [#allocation6], %s1545_s14, %s1545_s14, %s1546_s15  }
  0x29   : > { %s1384_s29 = scalar_lea.hbm %s1923_s5, 1024 }
  0x2a   : > { %p1385_p1 = scmp.ne.s32.totalorder %s1923_s5, %s1384_s29  ;;  %p1391_p13 = scmp.lt.u32.totalorder %s1384_s29, %s1923_s5 }
  0x2c   : > { %p1387_p11 = pnand %p1385_p1, %p1676_p9 }
  0x2e   : > { %p1388_p12 = pneg %p1387_p11 }
  0x30   : > { %p1393_p0 = pnand %p1391_p13, %p1388_p12 }
  0x32   : > { %1396 = shalt.err (!%p1393_p0)
}
  0x33   : > { %s1397_s27 = scalar_lea.vmem %s1664_s30, 1024  ;;  %p1405_p8 = scmp.lt.s32.totalorder %s1664_s30, %s1664_s30 }
  0x34   : > { %p1398_p2 = scmp.ne.s32.totalorder %s1664_s30, %s1397_s27  ;;  %p1406_p10 = scmp.lt.s32.totalorder %s1397_s27, %s1397_s27 }
  0x36   : > { %p1400_p3 = pnand %p1398_p2, %p1676_p9  ;;  %p1407_p1 = por %p1406_p10, %p1405_p8 }
  0x38   : > { %p1401_p6 = pneg %p1400_p3 }
  0x3a   : > { %p1408_p11 = pnand %p1407_p1, %p1401_p6 }
  0x3c   : > { %1411 = shalt.err (!%p1408_p11)
}
  0x3d   : > { %1265 = dma.hbm_to_vmem [thread:$0]  (!%p1660_p7), %s1923_s5, 1024, %s1664_s30, [#allocation9], %s1545_s14, %s1545_s14, %s1546_s15  }
  0x3e   : > { %s1412_s17 = scalar_lea.hbm %s1921_s3, 1024 }
  0x3f   : > { %p1413_p12 = scmp.ne.s32.totalorder %s1921_s3, %s1412_s17  ;;  %p1419_p2 = scmp.lt.u32.totalorder %s1412_s17, %s1921_s3 }
  0x41   : > { %p1415_p13 = pnand %p1413_p12, %p1676_p9 }
  0x43   : > { %p1416_p0 = pneg %p1415_p13 }
  0x45   : > { %p1421_p3 = pnand %p1419_p2, %p1416_p0 }
  0x47   : > { %1424 = shalt.err (!%p1421_p3)
}
  0x48   : > { %s1425_s27 = scalar_lea.vmem %s324_s13, 1024  ;;  %p1433_p1 = scmp.lt.s32.totalorder %s324_s13, %s324_s13 }
  0x49   : > { %p1426_p6 = scmp.ne.s32.totalorder %s324_s13, %s1425_s27  ;;  %p1434_p11 = scmp.lt.s32.totalorder %s1425_s27, %s1425_s27 }
  0x4b   : > { %p1428_p8 = pnand %p1426_p6, %p1676_p9  ;;  %p1435_p4 = por %p1434_p11, %p1433_p1 }
  0x4d   : > { %p1429_p10 = pneg %p1428_p8 }
  0x4f   : > { %p1436_p5 = pnand %p1435_p4, %p1429_p10 }
  0x51   : > { %1439 = shalt.err (!%p1436_p5)
}
  0x52   : > { %1262 = dma.hbm_to_vmem [thread:$0]  (!%p1660_p7), %s1921_s3, 1024, %s324_s13, [#allocation6], %s1545_s14, %s1545_s14, %s1546_s15  }
  0x53   : > { %s1547_s11 = smov [#allocation10]   ;;  %s1440_s18 = scalar_lea.hbm %s1925_s7, 1024 }
  0x54   : > { %s355_s10 = sshll.u32 %s1547_s11, 4  ;;  %p1441_p4 = scmp.ne.s32.totalorder %s1925_s7, %s1440_s18  ;;  %s356_s10 = int_to_ptr.vmem [resolvable:$true] %s355_s10 }
  0x55   : > { %p1447_p13 = scmp.lt.u32.totalorder %s1440_s18, %s1925_s7 }
  0x56   : > { %p1443_p5 = pnand %p1441_p4, %p1676_p9 }
  0x58   : > { %p1444_p12 = pneg %p1443_p5 }
  0x5a   : > { %p1449_p0 = pnand %p1447_p13, %p1444_p12 }
  0x5c   : > { %1452 = shalt.err (!%p1449_p0)
}
  0x5d   : > { %s1453_s13 = scalar_lea.vmem %s356_s10, 1024  ;;  %p1461_p8 = scmp.lt.s32.totalorder %s356_s10, %s356_s10 }
  0x5e   : > { %p1454_p2 = scmp.ne.s32.totalorder %s356_s10, %s1453_s13  ;;  %p1462_p10 = scmp.lt.s32.totalorder %s1453_s13, %s1453_s13 }
  0x60   : > { %p1456_p3 = pnand %p1454_p2, %p1676_p9  ;;  %p1463_p1 = por %p1462_p10, %p1461_p8 }
  0x62   : > { %p1457_p6 = pneg %p1456_p3 }
  0x64   : > { %p1464_p11 = pnand %p1463_p1, %p1457_p6 }
  0x66   : > { %1467 = shalt.err (!%p1464_p11)
}
  0x67   : > { %1268 = dma.hbm_to_vmem [thread:$0]  (!%p1660_p7), %s1925_s7, 1024, %s356_s10, [#allocation9], %s1545_s14, %s1545_s14, %s1546_s15  }
  0x68   : > { %s1770_s19 = sadd.s32 1, %s1540_s22   ;;  %s35_s28 = sadd.s32 1, %s1536_s21 }
  0x69   : > { %s32_s11 = ssub.s32 %s1540_s22, %s1770_s19  ;;  %p42_p9 = scmp.ne.s32.totalorder %s1536_s21, %s1532_s20 }
  0x6a   : > { %p33_p4 = scmp.eq.s32.totalorder %s32_s11, 0  ;;  %p43_p5 = scmp.eq.s32.totalorder %s1540_s22, 0 }
  0x6b   : > { %p1277_p12 = scmp.lt.s32.totalorder %s1540_s22, 2  ;;  %s378_s16 = sand.u32 1, %s1536_s21  }
  0x6c   : > { %s1781_s17 = scalar_select %p33_p4, %s1536_s21, %s35_s28  }
  0x6d   : > { %p44_p13 = por %p43_p5, %p42_p9  ;;  %s1070_s18 = sshll.u32 %s378_s16, 4 }
  0x6e   : > { %s1121_s26 = sshll.u32 %s1540_s22, 8  ;;  %s382_s14 = scalar_lea.vmem [#allocation3], %s1070_s18 }
  0x6f   : > { %s1787_s27 = scalar_lea.hbm %s1918_s0, %s1121_s26  ;;  %s389_s15 = sshll.u32 %s382_s14, 4  ;;  %s1793_s15 = int_to_ptr.vmem [resolvable:$true] %s389_s15 }
  0x70   : > { %p1789_p7 = pnand %p1277_p12, %p44_p13  ;;  %s1795_s13 = scalar_lea.sflag [#allocation4], %s378_s16 }
  0x71   : > { %s1468_s30 = scalar_lea.hbm %s1787_s27, 256  ;;  %s1473_s11 = scalar_lea.hbm %s1918_s0, 512 }
  0x72   : > { %p1469_p0 = scmp.ne.s32.totalorder %s1787_s27, %s1468_s30  ;;  %p1470_p2 = pneg %p1789_p7 }
  0x73   : > { %p1474_p8 = scmp.lt.u32.totalorder %s1787_s27, %s1918_s0  ;;  %p1475_p10 = scmp.lt.u32.totalorder %s1473_s11, %s1468_s30 }
  0x74   : > { %p1471_p3 = pnand %p1470_p2, %p1469_p0  ;;  %p1477_p11 = scmp.lt.u32.totalorder %s1468_s30, %s1787_s27 }
  0x75   : > { %p1476_p1 = por %p1475_p10, %p1474_p8 }
  0x76   : > { %p1472_p6 = pneg %p1471_p3 }
  0x77   : > { %p1478_p9 = por %p1477_p11, %p1476_p1 }
  0x79   : > { %p1479_p4 = pnand %p1478_p9, %p1472_p6 }
  0x7b   : > { %1482 = shalt.err (!%p1479_p4)
}
  0x7c   : > { %s1483_s16 = scalar_lea.vmem %s1793_s15, 256  ;;  %s1548_s29 = smov [#allocation3]  }
  0x7d   : > { %p1484_p5 = scmp.ne.s32.totalorder %s1793_s15, %s1483_s16  ;;  %s1488_s12 = sshll.u32 %s1548_s29, 4  ;;  %s1489_s12 = int_to_ptr.vmem [resolvable:$false] %s1488_s12 }
  0x7e   : > { %s1490_s14 = scalar_lea.vmem %s1489_s12, 512  ;;  %p1491_p0 = scmp.lt.s32.totalorder %s1793_s15, %s1489_s12 }
  0x7f   : > { %p1486_p12 = pnand %p1484_p5, %p1470_p2  ;;  %p1492_p3 = scmp.lt.s32.totalorder %s1490_s14, %s1483_s16 }
  0x81   : > { %p1487_p13 = pneg %p1486_p12  ;;  %p1493_p8 = por %p1492_p3, %p1491_p0 }
  0x83   : > { %p1494_p10 = pnand %p1493_p8, %p1487_p13 }
  0x85   : > { %1497 = shalt.err (!%p1494_p10)
}
  0x86   : > { %s1549_s30 = smov 128   ;;  %s1550_s9 = smov 8  }
  0x87   : > { %1272 = dma.hbm_to_vmem [thread:$0]  (!%p1789_p7), %s1787_s27, 256, %s1793_s15, %s1795_s13, %s1549_s30, %s1549_s30, %s1550_s9  }
  0x88   : > { %p1943_p2 = scmp.ne.s32.totalorder %s1939_s25, 0 }
  0x89   : > { %s403_s28 = sand.u32 (!%p1943_p2), 1, %s1532_s20   ;;  %p1944_p6 = scmp.ne.s32.totalorder (!%p1943_p2), %s1938_s24, 0 }
  0x8a   : > { %401 = sbr.rel (%p1943_p2) target bundleno = 1212 (0x4bc), region = 64  ;;  %s1826_s11 = sshll.u32 (!%p1943_p2), %s403_s28, 4 }
  0x8b   : > { %s404_s18 = scalar_lea.sflag (!%p1943_p2), [#allocation4], %s403_s28  ;;  %s407_s26 = scalar_lea.vmem (!%p1943_p2), [#allocation3], %s1826_s11 }
  0x91   : > { %1515 = dma.done.wait (%p1944_p6), %s404_s18, 256  }
  0x92   : > { %1517 = vsyncadd (%p1944_p6), %s404_s18, 4294967040  ;;  %p1945_p1 = scmp.ne.s32.totalorder %s1937_s23, 0 }
  0x94   : > { %1519 = dma.done.wait (%p1945_p1), [#allocation6], 2048  }
  0x95   : > { %1521 = vsyncadd (%p1945_p1), [#allocation6], 4294965248 }
  0x96   : > { %1523 = dma.done.wait (%p1945_p1), [#allocation9], 2048  }
  0x97   : > { %1525 = vsyncadd (%p1945_p1), [#allocation9], 4294965248  ;;  %v1551_v1 = vmov 0.0   ;;  %vm1552_vm0 = vmmov 0   ;;  %v1324_v2 = vld [vmem:[#allocation5] sm:$0xff]   ;;  %v1325_v3 = vld [vmem:[#allocation5 + $0x8] sm:$0xff]  }
  0x98   : > { %1158 = vmatprep.subr.bf16.mxu0 %v1551_v1  ;;  %1174 = vmatprep.mubr.msk.bf16.mxu0 %vm1552_vm0, %v1551_v1  ;;  %v1326_v4 = vld [vmem:[#allocation5 + $0x10] sm:$0xff]   ;;  %v1332_v5 = vld [vmem:[#allocation7] sm:$0xff]   ;;  %v1327_v6 = vld [vmem:[#allocation5 + $0x18] sm:$0xff]   ;;  %s1946_s14 = sld [smem:[#allocation14_spill]]  ;;  %s1947_s30 = sadd.s32 4294967295, %s1540_s22   ;;  %vm954_vm1 = vcmask 7168  }
  0x99   : > { %1178 = vmatprep.subr.bf16.mxu1 %v1551_v1  ;;  %1194 = vmatprep.mubr.msk.bf16.mxu1 %vm1552_vm0, %v1551_v1  ;;  %v1333_v7 = vld [vmem:[#allocation7 + $0x8] sm:$0xff]   ;;  %v1328_v8 = vld [vmem:[#allocation5 + $0x20] sm:$0xff]   ;;  %v1334_v9 = vld [vmem:[#allocation7 + $0x10] sm:$0xff]   ;;  %s1079_s9 = sshll.u32 %s1947_s30, 1 }
  0x9a   : > { %1159 = vmatpush3.bf16.msra.mxu0 %v1324_v2  ;;  %1179 = vmatpush3.bf16.msra.mxu1 %v1332_v5  ;;  %v1329_v10 = vld [vmem:[#allocation5 + $0x28] sm:$0xff]   ;;  %v1335_v11 = vld [vmem:[#allocation7 + $0x18] sm:$0xff]   ;;  %v1330_v12 = vld [vmem:[#allocation5 + $0x30] sm:$0xff]   ;;  %p464_p7 = scmp.lt.s32.totalorder %s1079_s9, 3 }
  0x9b   : > { %1160 = vmatprep.subr.bf16.mxu0 %v1551_v1  ;;  %1180 = vmatprep.subr.bf16.mxu1 %v1551_v1  ;;  %v1336_v13 = vld [vmem:[#allocation7 + $0x20] sm:$0xff]   ;;  %v1331_v14 = vld [vmem:[#allocation5 + $0x38] sm:$0xff]   ;;  %v1337_v17 = vld [vmem:[#allocation7 + $0x28] sm:$0xff]  }
  0x9c   : > { %v470_v15 = vld [vmem:[%s407_s26] sm:$0xff]  ;;  %v471_v16 = vld [vmem:[%s407_s26 + $0x8] sm:$0xff]  ;;  %s1954_s9 = smov (!%p464_p7, %s1079_s9), 3  ;;  %s1948_s26 = sld [smem:[#allocation15_spill]] }
  0x9d   : > { %v472_v18 = vpack.c.bf16 %v471_v16, %v470_v15  ;;  %v1338_v19 = vld [vmem:[#allocation7 + $0x30] sm:$0xff]   ;;  %v1339_v20 = vld [vmem:[#allocation7 + $0x38] sm:$0xff]   ;;  %v1340_v21 = vld [vmem:[#allocation8] sm:$0xff]   ;;  %s1080_s28 = sshll.u32 %s1954_s9, 3 }
  0x9e   : > { %1161 = vmatpush3.bf16.msra.mxu0 %v1325_v3  ;;  %1181 = vmatpush3.bf16.msra.mxu1 %v1333_v7  ;;  %v1341_v22 = vld [vmem:[#allocation8 + $0x8] sm:$0xff]   ;;  %v1342_v23 = vld [vmem:[#allocation8 + $0x10] sm:$0xff]   ;;  %v1343_v24 = vld [vmem:[#allocation8 + $0x18] sm:$0xff]  }
  0x9f   : > { %1162 = vmatprep.subr.bf16.mxu0 %v1551_v1  ;;  %1182 = vmatprep.subr.bf16.mxu1 %v1551_v1  ;;  %v1344_v25 = vld [vmem:[#allocation8 + $0x20] sm:$0xff]   ;;  %v1345_v26 = vld [vmem:[#allocation8 + $0x28] sm:$0xff]   ;;  %v1081_v27 = vld [vmem:[%s1920_s2] ss:$0 sm:$0xff] }
  0xa0   : > { %v1346_v37 = vld [vmem:[#allocation8 + $0x30] sm:$0xff]   ;;  %v1347_v38 = vld [vmem:[#allocation8 + $0x38] sm:$0xff]   ;;  %v1348_v39 = vld [vmem:[#allocation10] sm:$0xff]  }
  0xa1   : > { %v1349_v40 = vld [vmem:[#allocation10 + $0x8] sm:$0xff]   ;;  %v1350_v41 = vld [vmem:[#allocation10 + $0x10] sm:$0xff]   ;;  %v1351_v42 = vld [vmem:[#allocation10 + $0x18] sm:$0xff]  }
  0xa2   : > { %1163 = vmatpush3.bf16.msra.mxu0 %v1326_v4  ;;  %1183 = vmatpush3.bf16.msra.mxu1 %v1334_v9  ;;  %v1352_v43 = vld [vmem:[#allocation10 + $0x20] sm:$0xff]   ;;  %v1353_v44 = vld [vmem:[#allocation10 + $0x28] sm:$0xff]   ;;  %v1090_v45 = vld [vmem:[%s1922_s4] ss:$0 sm:$0xff]  ;;  %s467_s23 = scalar_lea.vmem %s1948_s26, %s1080_s28 }
  0xa3   : > { %1164 = vmatprep.subr.bf16.mxu0 %v1551_v1  ;;  %1184 = vmatprep.subr.bf16.mxu1 %v1551_v1  ;;  %v1354_v55 = vld [vmem:[#allocation10 + $0x30] sm:$0xff]   ;;  %v1355_v56 = vld [vmem:[#allocation10 + $0x38] sm:$0xff]  }
  0xa4   : > { %v1099_v57 = vld [vmem:[%s1924_s6] ss:$0 sm:$0xff] }
  0xa5   : > { %v1118_v15 = vld [vmem:[#allocation2] ss:$0 sm:$0xff] }
  0xa6   : > { %1165 = vmatpush3.bf16.msra.mxu0 %v1327_v6  ;;  %1185 = vmatpush3.bf16.msra.mxu1 %v1335_v11 }
  0xa7   : > { %1166 = vmatprep.subr.bf16.mxu0 %v1551_v1  ;;  %1186 = vmatprep.subr.bf16.mxu1 %v1551_v1 }
  0xaa   : > { %1167 = vmatpush3.bf16.msra.mxu0 %v1328_v8  ;;  %1187 = vmatpush3.bf16.msra.mxu1 %v1336_v13  ;;  %v1117_v8 = vld [vmem:[%s1946_s14] ss:$0 sm:$0xff] }
  0xab   : > { %1168 = vmatprep.subr.bf16.mxu0 %v1551_v1  ;;  %1188 = vmatprep.subr.bf16.mxu1 %v1551_v1 }
  0xae   : > { %1169 = vmatpush3.bf16.msra.mxu0 %v1329_v10  ;;  %1189 = vmatpush3.bf16.msra.mxu1 %v1337_v17 }
  0xaf   : > { %1170 = vmatprep.subr.bf16.mxu0 %v1551_v1  ;;  %1190 = vmatprep.subr.bf16.mxu1 %v1551_v1 }
  0xb2   : > { %1171 = vmatpush3.bf16.msra.mxu0 %v1330_v12  ;;  %1191 = vmatpush3.bf16.msra.mxu1 %v1338_v19 }
  0xb3   : > { %1172 = vmatprep.subr.bf16.mxu0 %v1551_v1  ;;  %1192 = vmatprep.subr.bf16.mxu1 %v1551_v1 }
  0xb6   : > { %1173 = vmatpush3.bf16.msra.mxu0 %v1331_v14  ;;  %1193 = vmatpush3.bf16.msra.mxu1 %v1339_v20 }
  0xb7   : > { %1198 = vmatprep.subr.bf16.mxu0 %v1551_v1  ;;  %1218 = vmatprep.subr.bf16.mxu1 %v1551_v1 }
  0xb9   : > { %1175 = vmatmul.mubr.bf16.vlgmr.msra.gmra.mrb[0].mxu0 %v472_v18 }
  0xba   : > { %1214 = vmatprep.mubr.msk.bf16.mxu0 %vm1552_vm0, %v1551_v1  ;;  %1199 = vmatpush3.bf16.msra.mxu0 %v1340_v21 }
  0xbb   : > { %1200 = vmatprep.subr.bf16.mxu0 %v1551_v1 }
  0xbe   : > { %1201 = vmatpush3.bf16.msra.mxu0 %v1341_v22 }
  0xbf   : > { %1202 = vmatprep.subr.bf16.mxu0 %v1551_v1 }
  0xc2   : > { %1203 = vmatpush3.bf16.msra.mxu0 %v1342_v23 }
  0xc3   : > { %1204 = vmatprep.subr.bf16.mxu0 %v1551_v1 }
  0xc6   : > { %1205 = vmatpush3.bf16.msra.mxu0 %v1343_v24 }
  0xc7   : > { %1206 = vmatprep.subr.bf16.mxu0 %v1551_v1 }
  0xca   : > { %1207 = vmatpush3.bf16.msra.mxu0 %v1344_v25 }
  0xcb   : > { %1208 = vmatprep.subr.bf16.mxu0 %v1551_v1 }
  0xce   : > { %1209 = vmatpush3.bf16.msra.mxu0 %v1345_v26 }
  0xcf   : > { %1210 = vmatprep.subr.bf16.mxu0 %v1551_v1 }
  0xd2   : > { %1211 = vmatpush3.bf16.msra.mxu0 %v1346_v37 }
  0xd3   : > { %1212 = vmatprep.subr.bf16.mxu0 %v1551_v1 }
  0xd6   : > { %1213 = vmatpush3.bf16.msra.mxu0 %v1347_v38 }
 0x18c   : > { %v578_v28 = vpop.f32.mrb[0].mxu0 }
 0x18d   : > { %v579_v29 = vadd.f32 %v1081_v27, %v578_v28  ;;  %v1176_v30 = vpop.f32.mrb[1].mxu0 }
 0x18e   : > { %v581_v31 = vpop.f32.mrb[2].mxu0 }
 0x18f   : > { %v582_v32 = vadd.f32 %v1081_v27, %v581_v31  ;;  %v1177_v33 = vpop.f32.mrb[3].mxu0  ;;  %v585_v34 = vmax.f32 %v579_v29, 0.0 }
 0x191   : > { %v586_v35 = vmax.f32 %v582_v32, 0.0 }
 0x193   : > { %v587_v36 = vpack.c.bf16 %v586_v35, %v585_v34 }
 0x195   : > { %1195 = vmatmul.mubr.bf16.vlgmr.msra.gmra.mrb[0].mxu1 %v587_v36 }
 0x196   : > { %1234 = vmatprep.mubr.msk.bf16.mxu1 %vm1552_vm0, %v1551_v1  ;;  %1219 = vmatpush3.bf16.msra.mxu1 %v1348_v39 }
 0x197   : > { %1220 = vmatprep.subr.bf16.mxu1 %v1551_v1 }
 0x19a   : > { %1221 = vmatpush3.bf16.msra.mxu1 %v1349_v40 }
 0x19b   : > { %1222 = vmatprep.subr.bf16.mxu1 %v1551_v1 }
 0x19e   : > { %1223 = vmatpush3.bf16.msra.mxu1 %v1350_v41 }
 0x19f   : > { %1224 = vmatprep.subr.bf16.mxu1 %v1551_v1 }
 0x1a2   : > { %1225 = vmatpush3.bf16.msra.mxu1 %v1351_v42 }
 0x1a3   : > { %1226 = vmatprep.subr.bf16.mxu1 %v1551_v1 }
 0x1a6   : > { %1227 = vmatpush3.bf16.msra.mxu1 %v1352_v43 }
 0x1a7   : > { %1228 = vmatprep.subr.bf16.mxu1 %v1551_v1 }
 0x1aa   : > { %1229 = vmatpush3.bf16.msra.mxu1 %v1353_v44 }
 0x1ab   : > { %1230 = vmatprep.subr.bf16.mxu1 %v1551_v1 }
 0x1ae   : > { %1231 = vmatpush3.bf16.msra.mxu1 %v1354_v55 }
 0x1af   : > { %1232 = vmatprep.subr.bf16.mxu1 %v1551_v1  ;;  %v1108_v1 = vld [vmem:[%s1926_s8] ss:$0 sm:$0xff] }
 0x1b2   : > { %1233 = vmatpush3.bf16.msra.mxu1 %v1355_v56 }
 0x268   : > { %v693_v46 = vpop.f32.mrb[0].mxu1 }
 0x269   : > { %v694_v47 = vadd.f32 %v1090_v45, %v693_v46  ;;  %v1196_v48 = vpop.f32.mrb[1].mxu1 }
 0x26a   : > { %v696_v49 = vpop.f32.mrb[2].mxu1 }
 0x26b   : > { %v697_v50 = vadd.f32 %v1090_v45, %v696_v49  ;;  %v1197_v51 = vpop.f32.mrb[3].mxu1  ;;  %v700_v52 = vmax.f32 %v694_v47, 0.0 }
 0x26d   : > { %v701_v53 = vmax.f32 %v697_v50, 0.0 }
 0x26f   : > { %v702_v54 = vpack.c.bf16 %v701_v53, %v700_v52 }
 0x271   : > { %1215 = vmatmul.mubr.bf16.vlgmr.msra.gmra.mrb[4].mxu0 %v702_v54 }
 0x344   : > { %v808_v58 = vpop.f32.mrb[4].mxu0 }
 0x345   : > { %v809_v59 = vadd.f32 %v1099_v57, %v808_v58  ;;  %v1216_v60 = vpop.f32.mrb[5].mxu0 }
 0x346   : > { %v811_v61 = vpop.f32.mrb[6].mxu0 }
 0x347   : > { %v812_v62 = vadd.f32 %v1099_v57, %v811_v61  ;;  %v1217_v63 = vpop.f32.mrb[7].mxu0  ;;  %v815_v0 = vmax.f32 %v809_v59, 0.0 }
 0x349   : > { %v816_v2 = vmax.f32 %v812_v62, 0.0 }
 0x34b   : > { %v817_v3 = vpack.c.bf16 %v816_v2, %v815_v0 }
 0x34d   : > { %1235 = vmatmul.mubr.bf16.vlgmr.msra.gmra.mrb[4].mxu1 %v817_v3 }
 0x420   : > { %v923_v4 = vpop.f32.mrb[4].mxu1 }
 0x421   : > { %v924_v5 = vadd.f32 %v1108_v1, %v923_v4  ;;  %v1236_v6 = vpop.f32.mrb[5].mxu1 }
 0x422   : > { %v926_v7 = vpop.f32.mrb[6].mxu1 }
 0x423   : > { %v930_v9 = vmax.f32 %v924_v5, 0.0  ;;  %v927_v10 = vadd.f32 %v1108_v1, %v926_v7  ;;  %v1237_v11 = vpop.f32.mrb[7].mxu1 }
 0x425   : > { %v931_v12 = vmax.f32 %v927_v10, 0.0  ;;  %v939_v13 = vmul.f32 %v1117_v8, %v930_v9 }
 0x427   : > { %941 = vadd.xlane.f32.xlu0 %v939_v13  ;;  %v940_v14 = vmul.f32 %v1117_v8, %v931_v12 }
 0x42b   : > { %943 = vadd.xlane.f32.xlu0 %v940_v14 }
 0x4b4   : > { %v942_v16 = vpop.xlane.xlu0 %941 }
 0x4b5   : > { %v952_v17 = vadd.f32 %v1118_v15, %v942_v16 }
 0x4b7   : > { %955 = vst.msk [vmem:[%s467_s23] sm:$0xff] %vm954_vm1, %v952_v17 }
 0x4b8   : > { %v944_v18 = vpop.xlane.xlu0 %943 }
 0x4b9   : > { %v953_v19 = vadd.f32 %v1118_v15, %v944_v18 }
 0x4bb   : > { %956 = vst.msk [vmem:[%s467_s23 + $0x8] sm:$0xff] %vm954_vm1, %v953_v19 }
 0x4bc PF: > { %s1949_s22 = smov %s1770_s19  ;;  %p25_p11 = scmp.ge.s32.totalorder %s1770_s19, 4  }
 0x4bd   : > { %s1950_s19 = smov %s1532_s20  ;;  %s1951_s20 = smov %s1536_s21 }
 0x4be   : > { %s1952_s21 = smov %s1781_s17  ;;  %27 = sbr.rel (!%p25_p11) target bundleno = 8 (0x8), region = 120 }
 0x4c5   :  { %979 = vsyncpa [#allocation4], 1 }
 0x4c6   :  { %981 = vsyncpa [#allocation4 + $0x1], 1 }
 0x4c7   :  { %982 = vsyncpa [#allocation6], 1 }
 0x4c8   :  { %983 = vsyncpa [#allocation9], 1 }

</bundles_post_ra>
